<compile_context>
chip_gen: v5e
topology: v5e:2x2
jax: 0.10.0
libtpu: 0.0.40
codegen_flags: <defaults>
</compile_context>

<pallas_src>
import functools

import jax
import jax.numpy as jnp
from jax.experimental import pallas as pl
from jax.experimental.pallas import tpu as pltpu


def _se_kernel(x_ref, w1_ref, w2_ref, o_ref, *, hw_true):
    # x_ref : (C, HWp)  one batch element, spatial flattened on the lane axis
    # w1_ref: (Crp, C)  fc1 weight, PyTorch (out, in) layout, rows zero-padded
    # w2_ref: (C, Crp)  fc2 weight, PyTorch (out, in) layout, cols zero-padded
    x = x_ref[...].astype(jnp.float32)

    # Global average pool: cross-lane sum (XLU), divide by the true spatial
    # size (zero padding in the lane dim does not affect the sum).
    pooled = jnp.sum(x, axis=-1, keepdims=True) * (1.0 / hw_true)       # (C, 1)

    # Broadcast the pooled vector across a full 128-lane tile so both FC
    # matmuls use native MXU tile shapes (all 128 result columns identical).
    pooled_b = jnp.broadcast_to(pooled, (pooled.shape[0], 128))         # (C, 128)

    hidden = jnp.dot(w1_ref[...], pooled_b,
                     preferred_element_type=jnp.float32)                # (Crp, 128)
    hidden = jnp.maximum(hidden, 0.0)                                   # ReLU

    logits = jnp.dot(w2_ref[...], hidden,
                     preferred_element_type=jnp.float32)[:, :1]         # (C, 1)
    gate = 1.0 / (1.0 + jnp.exp(-logits))                               # sigmoid (EUP)

    # Channel-wise rescale: (C, 1) gate broadcast across the lane axis.
    o_ref[...] = (x * gate).astype(o_ref.dtype)


def se_layer_forward(x, fc1_weight, fc2_weight):
    """SELayer forward.

    x          : (B, C, H, W) float32
    fc1_weight : (C // reduction, C)   -- nn.Linear(channel, channel//r).weight
    fc2_weight : (C, C // reduction)   -- nn.Linear(channel//r, channel).weight
    """
    B, C, H, W = x.shape
    Cr = fc1_weight.shape[0]
    HW = H * W

    # Flatten spatial dims (pure reshape, no HBM transpose) and pad the lane
    # dimension to a multiple of 128 for unmasked, lane-dense loads/stores.
    HWp = ((HW + 127) // 128) * 128
    xf = x.reshape(B, C, HW).astype(jnp.float32)
    if HWp != HW:
        xf = jnp.pad(xf, ((0, 0), (0, 0), (0, HWp - HW)))

    # Pad the bottleneck dim to a sublane multiple; padding is mathematically
    # inert (extra hidden units are relu(0)=0 and feed zero columns of W2).
    Crp = max(8, ((Cr + 7) // 8) * 8)
    w1 = jnp.pad(fc1_weight.astype(jnp.float32), ((0, Crp - Cr), (0, 0)))  # (Crp, C)
    w2 = jnp.pad(fc2_weight.astype(jnp.float32), ((0, 0), (0, Crp - Cr)))  # (C, Crp)

    cost = pl.CostEstimate(
        flops=int(B * (C * HW          # pool reduction
                       + 2 * Crp * C * 128 + 2 * C * Crp * 128  # tiny FCs
                       + C * HW)),     # rescale
        transcendentals=int(B * C),
        bytes_accessed=int(2 * B * C * HWp * 4 + 2 * C * Crp * 4),
    )

    out = pl.pallas_call(
        functools.partial(_se_kernel, hw_true=float(HW)),
        out_shape=jax.ShapeDtypeStruct((B, C, HWp), jnp.float32),
        grid_spec=pltpu.PrefetchScalarGridSpec(
            num_scalar_prefetch=0,
            grid=(B,),
            in_specs=[
                pl.BlockSpec((None, C, HWp), lambda b: (b, 0, 0)),  # one image
                pl.BlockSpec((Crp, C), lambda b: (0, 0)),           # fc1 weight (resident)
                pl.BlockSpec((C, Crp), lambda b: (0, 0)),           # fc2 weight (resident)
            ],
            out_specs=pl.BlockSpec((None, C, HWp), lambda b: (b, 0, 0)),
        ),
        compiler_params=pltpu.CompilerParams(
            dimension_semantics=("parallel",)),
        cost_estimate=cost,
    )(xf, w1, w2)

    if HWp != HW:
        out = out[:, :, :HW]
    return out.reshape(B, C, H, W)


def _reference(x, fc1_weight, fc2_weight):
    y = x.mean(axis=(2, 3))                       # (B, C)
    y = jnp.maximum(y @ fc1_weight.T, 0.0)        # (B, Cr)
    y = jax.nn.sigmoid(y @ fc2_weight.T)          # (B, C)
    return x * y[:, :, None, None]


if __name__ == "__main__":
    # SELayer(channel=32, reduction=16) -> hidden = 2
    B, C, H, W = 2, 32, 16, 16
    reduction = 16
    Cr = C // reduction

    key = jax.random.PRNGKey(0)
    kx, k1, k2 = jax.random.split(key, 3)
    x = jax.random.normal(kx, (B, C, H, W), jnp.float32)
    fc1_w = jax.random.normal(k1, (Cr, C), jnp.float32) * (1.0 / float(C) ** 0.5)
    fc2_w = jax.random.normal(k2, (C, Cr), jnp.float32) * (1.0 / float(Cr) ** 0.5)

    out = se_layer_forward(x, fc1_w, fc2_w)
    out = jax.block_until_ready(out)

    ref = _reference(x, fc1_w, fc2_w)
    assert out.shape == (B, C, H, W)
    assert jnp.allclose(out, ref, atol=1e-4, rtol=1e-4), "mismatch vs reference"

    print("KERNEL_OK")
</pallas_src>

<mosaic_0001>
module attributes {stable_mosaic.version = 11 : i64} {
  func.func @_se_kernel(%arg0: i32, %arg1: memref<1x32x256xf32, #tpu.memory_space<vmem>>, %arg2: memref<8x32xf32, #tpu.memory_space<vmem>>, %arg3: memref<32x8xf32, #tpu.memory_space<vmem>>, %arg4: memref<1x32x256xf32, #tpu.memory_space<vmem>>) attributes {dimension_semantics = [#tpu.dimension_semantics<parallel>], iteration_bounds = array<i64: 2>, scalar_prefetch = 0 : i64, scratch_operands = 0 : i64, tpu.core_type = #tpu.core_type<tc>, window_params = [{transform_indices = @transform_0, window_bounds = array<i64: 1, 32, 256>}, {pipeline_mode = #tpu.pipeline_mode<synchronous>, transform_indices = @transform_1, window_bounds = array<i64: 8, 32>}, {pipeline_mode = #tpu.pipeline_mode<synchronous>, transform_indices = @transform_2, window_bounds = array<i64: 32, 8>}, {transform_indices = @transform_3, window_bounds = array<i64: 1, 32, 256>}]} {
    %c0 = arith.constant 0 : index
    %c0_0 = arith.constant 0 : index
    %c0_1 = arith.constant 0 : index
    %0 = vector.load %arg1[%c0, %c0_0, %c0_1] : memref<1x32x256xf32, #tpu.memory_space<vmem>>, vector<1x32x256xf32>
    %1 = vector.shape_cast %0 : vector<1x32x256xf32> to vector<32x256xf32>
    %cst = arith.constant dense<0.000000e+00> : vector<32xf32>
    %2 = vector.multi_reduction <add>, %1, %cst [1] : vector<32x256xf32> to vector<32xf32>
    %3 = vector.shape_cast %2 : vector<32xf32> to vector<32x1xf32>
    %cst_2 = arith.constant 3.906250e-03 : f32
    %4 = vector.broadcast %cst_2 : f32 to vector<32x1xf32>
    %5 = arith.mulf %3, %4 : vector<32x1xf32>
    %6 = vector.shape_cast %5 : vector<32x1xf32> to vector<32x1xf32>
    %7 = vector.broadcast %6 : vector<32x1xf32> to vector<32x128xf32>
    %c0_3 = arith.constant 0 : index
    %c0_4 = arith.constant 0 : index
    %8 = vector.load %arg2[%c0_3, %c0_4] : memref<8x32xf32, #tpu.memory_space<vmem>>, vector<8x32xf32>
    %cst_5 = arith.constant dense<0.000000e+00> : vector<8x128xf32>
    %9 = tpu.matmul %8, %7, %cst_5 {dimension_numbers = #tpu.dot_dimension_numbers<[1], [0], [0], [1], [0, 0, 1, 1], [], []>} : vector<8x32xf32>, vector<32x128xf32>, vector<8x128xf32> -> vector<8x128xf32>
    %cst_6 = arith.constant 0.000000e+00 : f32
    %10 = vector.broadcast %cst_6 : f32 to vector<8x128xf32>
    %11 = arith.maximumf %9, %10 : vector<8x128xf32>
    %c0_7 = arith.constant 0 : index
    %c0_8 = arith.constant 0 : index
    %12 = vector.load %arg3[%c0_7, %c0_8] : memref<32x8xf32, #tpu.memory_space<vmem>>, vector<32x8xf32>
    %cst_9 = arith.constant dense<0.000000e+00> : vector<32x128xf32>
    %13 = tpu.matmul %12, %11, %cst_9 {dimension_numbers = #tpu.dot_dimension_numbers<[1], [0], [0], [1], [0, 0, 1, 1], [], []>} : vector<32x8xf32>, vector<8x128xf32>, vector<32x128xf32> -> vector<32x128xf32>
    %14 = vector.extract_strided_slice %13 {offsets = [0, 0], sizes = [32, 1], strides = [1, 1]} : vector<32x128xf32> to vector<32x1xf32>
    %cst_10 = arith.constant 0.000000e+00 : f32
    %15 = vector.broadcast %cst_10 : f32 to vector<32x1xf32>
    %16 = arith.subf %15, %14 : vector<32x1xf32>
    %17 = math.exp %16 : vector<32x1xf32>
    %cst_11 = arith.constant 1.000000e+00 : f32
    %18 = vector.broadcast %cst_11 : f32 to vector<32x1xf32>
    %19 = arith.addf %18, %17 : vector<32x1xf32>
    %cst_12 = arith.constant 1.000000e+00 : f32
    %20 = vector.broadcast %cst_12 : f32 to vector<32x1xf32>
    %21 = arith.divf %20, %19 : vector<32x1xf32>
    %22 = vector.broadcast %21 : vector<32x1xf32> to vector<32x256xf32>
    %23 = arith.mulf %1, %22 : vector<32x256xf32>
    %c0_13 = arith.constant 0 : index
    %c0_14 = arith.constant 0 : index
    %c0_15 = arith.constant 0 : index
    %24 = vector.load %arg4[%c0_13, %c0_14, %c0_15] : memref<1x32x256xf32, #tpu.memory_space<vmem>>, vector<1x32x256xf32>
    %25 = vector.shape_cast %24 : vector<1x32x256xf32> to vector<32x256xf32>
    %26 = vector.shape_cast %23 : vector<32x256xf32> to vector<1x32x256xf32>
    tpu.vector_store %arg4[%c0_13, %c0_14, %c0_15], %26 {strides = array<i32>} : memref<1x32x256xf32, #tpu.memory_space<vmem>>, vector<1x32x256xf32>,
    return
  }
  func.func @transform_0(%arg0: i32) -> (i32, i32, i32) {
    %c0_i32 = arith.constant 0 : i32
    %c0_i32_0 = arith.constant 0 : i32
    %c0_i32_1 = arith.constant 0 : i32
    return %arg0, %c0_i32, %c0_i32_0 : i32, i32, i32
  }
  func.func @transform_1(%arg0: i32) -> (i32, i32) {
    %c0_i32 = arith.constant 0 : i32
    %c0_i32_0 = arith.constant 0 : i32
    %c0_i32_1 = arith.constant 0 : i32
    return %c0_i32, %c0_i32_0 : i32, i32
  }
  func.func @transform_2(%arg0: i32) -> (i32, i32) {
    %c0_i32 = arith.constant 0 : i32
    %c0_i32_0 = arith.constant 0 : i32
    %c0_i32_1 = arith.constant 0 : i32
    return %c0_i32, %c0_i32_0 : i32, i32
  }
  func.func @transform_3(%arg0: i32) -> (i32, i32, i32) {
    %c0_i32 = arith.constant 0 : i32
    %c0_i32_0 = arith.constant 0 : i32
    %c0_i32_1 = arith.constant 0 : i32
    return %arg0, %c0_i32, %c0_i32_0 : i32, i32, i32
  }
}

</mosaic_0001>

<bundles_post_ra>
// kernel: tpu_custom_call.1
= control target key start
LH: loop header
LB: loop body
LE: loop exit
PB: predicated region body
PF: predicated region fallthrough
CT: control target
= control target key end

     0   :  { %8 = vsyncpa [#allocation3], 0  ;;  %s882_s0 = inlined_call_operand.hbm [shape: f32[2,32,256], index: 0, kind: input, shape index: {}]   ;;  %s883_s1 = inlined_call_operand.vmem [shape: f32[8,32], index: 1, kind: input, shape index: {}]   ;;  %s884_s2 = inlined_call_operand.vmem [shape: f32[32,8], index: 2, kind: input, shape index: {}]   ;;  %s885_s3 = inlined_call_operand.hbm [shape: f32[2,32,256], index: 3, kind: output, shape index: {}]  }
   0x1   :  { %10 = vsyncpa [#allocation3 + $0x1], 0 }
   0x2   :  { %11 = vsyncpa [#allocation4], 0 }
   0x3   :  { %13 = vsyncpa [#allocation4 + $0x1], 0  ;;  %s704_s12 = smov 0   ;;  %s706_s13 = smov 0  }
   0x4   :  { %s708_s14 = smov 0   ;;  %s710_s15 = smov 0  }
   0x5 LB: > { %s725_s16 = sadd.s32 4294967295, %s677_s15   ;;  %s488_s17 = sadd.s32 4294967294, %s677_s15   ;;  %s677_s15 = sphi %s710_s15, %s895_s15   ;;  %s673_s14 = sphi %s708_s14, %s894_s14   ;;  %s669_s13 = sphi %s706_s13, %s893_s13   ;;  %s665_s12 = sphi %s704_s12, %s892_s12  }
   0x6   : > { %s729_s18 = sadd.s32 1, %s677_s15   ;;  %s26_s19 = sadd.s32 1, %s673_s14 }
   0x7   : > { %s23_s20 = ssub.s32 %s677_s15, %s729_s18  ;;  %p33_p0 = scmp.ne.s32.totalorder %s673_s14, %s669_s13 }
   0x8   : > { %p24_p1 = scmp.eq.s32.totalorder %s23_s20, 0  ;;  %p34_p2 = scmp.eq.s32.totalorder %s677_s15, 0 }
   0x9   : > { %p39_p3 = scmp.ne.s32.totalorder %s669_s13, %s665_s12  ;;  %p40_p4 = scmp.eq.s32.totalorder %s725_s16, 0 }
   0xa   : > { %s741_s21 = scalar_select %p24_p1, %s673_s14, %s26_s19  }
   0xb   : > { %p743_p5 = por %p34_p2, %p33_p0  ;;  %p747_p6 = por %p40_p4, %p39_p3 }
   0xc   : > { %p105_p7 = scmp.eq.s32.totalorder %s725_s16, 1  ;;  %p111_p8 = scmp.eq.s32.totalorder %s488_s17, 1 }
   0xd   : > { %p523_p10 = scmp.lt.s32.totalorder %s677_s15, 2  ;;  %s137_s26 = sand.u32 1, %s673_s14  }
   0xe   : > { %p754_p11 = por %p105_p7, %p33_p0  ;;  %p758_p12 = por %p111_p8, %p39_p3 }
   0xf   : > { %s507_s27 = sshll.u32 %s677_s15, 6  ;;  %s491_s28 = sshll.u32 %s137_s26, 6 }
  0x10   : > { %s146_s4 = scalar_lea.hbm %s882_s0, %s507_s27  ;;  %s141_s6 = scalar_lea.vmem [#allocation2], %s491_s28 }
  0x11   : > { %s147_s5 = sshll.u32 %s146_s4, 4  ;;  %s149_s7 = sshll.u32 %s141_s6, 4  ;;  %s148_s5 = int_to_ptr.hbm [resolvable:$true] %s147_s5  ;;  %s150_s7 = int_to_ptr.vmem [resolvable:$true] %s149_s7 }
  0x12   : > { %p769_p13 = pnand %p523_p10, %p743_p5  ;;  %p494_p0 = scmp.ge.s32.totalorder %s677_s15, 1 }
  0x13   : > { %p157_p1 = scmp.lt.s32.totalorder %s677_s15, 3  ;;  %s138_s9 = scalar_lea.sflag [#allocation3], %s137_s26 }
  0x14   : > { %s581_s10 = sshra.s32 %s148_s5, 4  ;;  %p585_p3 = pneg %p769_p13  ;;  %s582_s10 = int_to_ptr.hbm [resolvable:$true] %s581_s10 }
  0x15   : > { %s583_s11 = scalar_lea.hbm %s582_s10, 64  ;;  %s588_s20 = scalar_lea.hbm %s882_s0, 128 }
  0x16   : > { %p584_p2 = scmp.ne.s32.totalorder %s582_s10, %s583_s11  ;;  %p589_p5 = scmp.lt.s32.totalorder %s582_s10, %s882_s0 }
  0x17   : > { %p590_p8 = scmp.lt.s32.totalorder %s588_s20, %s583_s11 }
  0x18   : > { %p586_p4 = pnand %p585_p3, %p584_p2 }
  0x19   : > { %p591_p10 = por %p590_p8, %p589_p5 }
  0x1a   : > { %p587_p7 = pneg %p586_p4 }
  0x1c   : > { %p592_p9 = pnand %p591_p10, %p587_p7 }
  0x1e   : > { %595 = shalt.err (!%p592_p9)
}
  0x1f   : > { %s679_s26 = smov 256   ;;  %s680_s28 = smov 16  }
  0x20   : > { %518 = dma.hbm_to_vmem [thread:$0]  (!%p769_p13), %s148_s5, 1024, %s150_s7, %s138_s9, %s679_s26, %s679_s26, %s680_s28  }
  0x21   : > { %p158_p2 = pnand %p494_p0, %p157_p1 }
  0x22   : > { %s790_s29 = sand.u32 (!%p158_p2), 1, %s669_s13  }
  0x23   : > { %161 = sbr.rel (%p158_p2) target bundleno = 597 (0x255), region = 32  ;;  %s495_s30 = sshll.u32 (!%p158_p2), %s790_s29, 6 }
  0x24   : > { %s164_s4 = scalar_lea.sflag (!%p158_p2), [#allocation3], %s790_s29  ;;  %s167_s6 = scalar_lea.vmem (!%p158_p2), [#allocation2], %s495_s30 }
  0x28   : > { %656 = dma.done.wait (%p747_p6), %s164_s4, 1024  }
  0x29   : > { %658 = vsyncadd (%p747_p6), %s164_s4, 4294966272  ;;  %v800_v0 = vld [vmem:[%s167_s6 + $0x30] sm:$0xff]  ;;  %v802_v1 = vld [vmem:[%s167_s6 + $0x38] sm:$0xff]  ;;  %vm216_vm0 = vcmask 261120   ;;  %vm245_vm1 = vcmask 64512   ;;  %v681_v27 = vmov 0  }
  0x2a   : > { %v804_v2 = vld [vmem:[%s167_s6 + $0x10] sm:$0xff]  ;;  %v208_v3 = vadd.f32 %v802_v1, %v800_v0  ;;  %v808_v4 = vld [vmem:[%s167_s6 + $0x18] sm:$0xff]  ;;  %v812_v6 = vld [vmem:[%s167_s6 + $0x20] sm:$0xff]  ;;  %562 = vset.pattern.permute.xlu2 %v681_v27  ;;  %564 = vset.pattern.permute.xlu1 %v681_v27  ;;  %s190_s22 = scalar_lea.vmem [#allocation5], %s495_s30  ;;  %s508_s27 = sshll.u32 %s725_s16, 6 }
  0x2b   : > { %v202_v5 = vadd.f32 %v808_v4, %v804_v2  ;;  %v814_v7 = vld [vmem:[%s167_s6 + $0x28] sm:$0xff]  ;;  %v816_v8 = vld [vmem:[%s167_s6] sm:$0xff]  ;;  %v244_v25 = vld [vmem:[%s884_s2 + $0x18] sm:$0xff]  ;;  %563 = vset.pattern.permute.xlu0 %v681_v27  ;;  %s411_s30 = scalar_lea.hbm %s885_s3, %s508_s27  ;;  %s412_s4 = sshll.u32 %s190_s22, 4  ;;  %s413_s4 = int_to_ptr.vmem [resolvable:$true] %s412_s4 }
  0x2c   : > { %209 = vadd.xlane.f32.xlu0 %v208_v3  ;;  %v818_v9 = vld [vmem:[%s167_s6 + $0x8] sm:$0xff]  ;;  %v205_v10 = vadd.f32 %v814_v7, %v812_v6  ;;  %v215_v20 = vld [vmem:[%s883_s1] sm:$0xff]  ;;  %v243_v26 = vld [vmem:[%s884_s2 + $0x10] sm:$0xff]  ;;  %s414_s6 = sshll.u32 %s411_s30, 4  ;;  %s400_s16 = scalar_lea.sflag [#allocation4], %s790_s29  ;;  %s415_s6 = int_to_ptr.hbm [resolvable:$true] %s414_s6 }
  0x2d   : > { %203 = vadd.xlane.f32.xlu1 %v202_v5  ;;  %v199_v11 = vadd.f32 %v818_v9, %v816_v8  ;;  %v241_v23 = vld [vmem:[%s884_s2] sm:$0xff]  ;;  %v242_v24 = vld [vmem:[%s884_s2 + $0x8] sm:$0xff]  ;;  %s625_s23 = sshra.s32 %s415_s6, 4  ;;  %s631_s9 = scalar_lea.hbm %s885_s3, 128  ;;  %s626_s23 = int_to_ptr.hbm [resolvable:$true] %s625_s23 }
  0x2e   : > { %s627_s5 = scalar_lea.hbm %s626_s23, 64  ;;  %p632_p0 = scmp.lt.s32.totalorder %s626_s23, %s885_s3 }
  0x2f   : > { %p628_p6 = scmp.ne.s32.totalorder %s626_s23, %s627_s5  ;;  %p633_p1 = scmp.lt.s32.totalorder %s631_s9, %s627_s5 }
  0x31   : > { %p629_p9 = pnand %p628_p6, %p754_p11  ;;  %p634_p3 = por %p633_p1, %p632_p0 }
  0x33   : > { %p630_p13 = pneg %p629_p9 }
  0x34   : > { %206 = vadd.xlane.f32.xlu0 %v205_v10 }
  0x35   : > { %200 = vadd.xlane.f32.xlu1 %v199_v11  ;;  %p635_p4 = pnand %p634_p3, %p630_p13 }
  0x9f   : > { %v210_v12 = vpop.xlane.xlu0 %209 }
  0xa0   : > { %v214_v13 = vmul.f32 0.00390625, %v210_v12  ;;  %v204_v14 = vpop.xlane.xlu1 %203 }
  0xa1   : > { %v212_v18 = vmul.f32 0.00390625, %v204_v14 }
  0xa2   : > { %232 = vmatpush.msra.mxu0 %v214_v13 }
  0xa7   : > { %v207_v15 = vpop.xlane.xlu0 %206 }
  0xa8   : > { %v213_v16 = vmul.f32 0.00390625, %v207_v15  ;;  %v201_v17 = vpop.xlane.xlu1 %200 }
  0xa9   : > { %v211_v19 = vmul.f32 0.00390625, %v201_v17 }
  0xaa   : > { %233 = vmatpush.msra.mxu0 %v213_v16 }
  0xac   : > { %234 = vmatpush.msra.mxu0 %v212_v18 }
  0xae   : > { %235 = vmatpush.msra.mxu0 %v211_v19 }
  0xaf   : > { %497 = vmatmul.msk.f32.vlgmr.msra.gmra.mxu0 %vm216_vm0, %v215_v20 }
 0x12c   : > { %v237_v21 = vpop.f32.mrf.mxu0 }
 0x12d   : > { %v240_v22 = vmax.f32 %v237_v21, 0.0 }
 0x12f   : > { %273 = vmatpush.msra.mxu1 %v240_v22  ;;  %509 = vmatpush.msra.mxu2 %v240_v22 }
 0x130   : > { %510 = vmatpush.msra.mxu3 %v240_v22  ;;  %498 = vmatmul.msk.f32.vlgmr.msra.gmra.mxu1 %vm245_vm1, %v241_v23 }
 0x131   : > { %499 = vmatmul.msk.f32.vlgmr.msra.gmra.mxu2 %vm245_vm1, %v242_v24  ;;  %501 = vmatmul.msk.f32.vlgmr.msra.gmra.mxu3 %vm245_vm1, %v244_v25 }
 0x139   : > { %500 = vmatmul.msk.f32.gmra.mxu2 %vm245_vm1, %v243_v26 }
 0x1ad   : > { %v275_v28 = vpop.f32.mrf.mxu1 }
 0x1ae   : > { %v287_v29 = vsub.f32 0.0, %v275_v28 }
 0x1b0   : > { %v291_v30 = vmul.f32 1.442695, %v287_v29 }
 0x1b2   : > { %565 = vpow2.f32 %v291_v30 }
 0x1b4   : > { %v278_v31 = vpop.f32.mrf.mxu2  ;;  %v284_v32 = vpop.f32.mrf.mxu3 }
 0x1b5   : > { %v288_v33 = vsub.f32 0.0, %v278_v31  ;;  %v290_v34 = vsub.f32 0.0, %v284_v32 }
 0x1b7   : > { %v293_v35 = vmul.f32 1.442695, %v288_v33  ;;  %v297_v36 = vmul.f32 1.442695, %v290_v34 }
 0x1b8   : > { %v566_v37 = vpop.eup %565 }
 0x1b9   : > { %v299_v38 = vadd.f32 1.0, %v566_v37  ;;  %567 = vpow2.f32 %v293_v35 }
 0x1ba   : > { %569 = vpow2.f32 %v297_v36 }
 0x1bb   : > { %571 = vrcp.f32 %v299_v38  ;;  %v314_v48 = vand.u32 2147483648, %v299_v38  ;;  %vm308_vm2 = vweird.f32 %v299_v38  ;;  %v312_v50 = vand.u32 2147483647, %v299_v38 }
 0x1bc   : > { %v281_v39 = vpop.f32.mrf.mxu2 }
 0x1bd   : > { %v289_v40 = vsub.f32 0.0, %v281_v39  ;;  %v315_v53 = vor.u32 1.1754944e-38, %v314_v48  ;;  %vm313_vm5 = vcmp.eq.f32.partialorder %v312_v50, 8.507059e+37 }
 0x1bf   : > { %v568_v41 = vpop.eup %567  ;;  %v295_v42 = vmul.f32 1.442695, %v289_v40 }
 0x1c0   : > { %v570_v43 = vpop.eup %569  ;;  %v300_v44 = vadd.f32 1.0, %v568_v41 }
 0x1c1   : > { %v572_v45 = vpop.eup %571  ;;  %v302_v46 = vadd.f32 1.0, %v570_v43  ;;  %573 = vpow2.f32 %v295_v42 }
 0x1c2   : > { %575 = vrcp.f32 %v300_v44  ;;  %v304_v47 = vmul.f32 %v572_v45, %v299_v38  ;;  %vm309_vm3 = vweird.f32 %v572_v45  ;;  %v329_v10 = vand.u32 2147483648, %v300_v44 }
 0x1c3   : > { %577 = vrcp.f32 %v302_v46  ;;  %vm310_vm4 = vmor %vm308_vm2, %vm309_vm3  ;;  %vm353_vm6 = vweird.f32 %v302_v46  ;;  %v359_v3 = vand.u32 2147483648, %v302_v46  ;;  %v357_v12 = vand.u32 2147483647, %v302_v46 }
 0x1c4   : > { %v305_v49 = vsub.f32 1.0, %v304_v47  ;;  %v327_v13 = vand.u32 2147483647, %v300_v44  ;;  %vm323_vm9 = vweird.f32 %v300_v44  ;;  %v330_v19 = vor.u32 1.1754944e-38, %v329_v10 }
 0x1c5   : > { %v360_v17 = vor.u32 1.1754944e-38, %v359_v3  ;;  %vm358_vm12 = vcmp.eq.f32.partialorder %v357_v12, 8.507059e+37 }
 0x1c6   : > { %v306_v51 = vmul.f32 %v572_v45, %v305_v49  ;;  %vm328_vm13 = vcmp.eq.f32.partialorder %v327_v13, 8.507059e+37 }
 0x1c7   : > { %v574_v52 = vpop.eup %573 }
 0x1c8   : > { %v576_v54 = vpop.eup %575  ;;  %v301_v55 = vadd.f32 1.0, %v574_v52  ;;  %v307_v56 = vadd.f32 %v572_v45, %v306_v51 }
 0x1c9   : > { %v578_v57 = vpop.eup %577  ;;  %v319_v58 = vmul.f32 %v576_v54, %v300_v44  ;;  %vm324_vm7 = vweird.f32 %v576_v54 }
 0x1ca   : > { %579 = vrcp.f32 %v301_v55  ;;  %v311_v59 = vsel %vm310_vm4, %v572_v45, %v307_v56  ;;  %v349_v60 = vmul.f32 %v578_v57, %v302_v46  ;;  %vm354_vm8 = vweird.f32 %v578_v57  ;;  %vm325_vm10 = vmor %vm323_vm9, %vm324_vm7 }
 0x1cb   : > { %v316_v61 = vsel %vm313_vm5, %v315_v53, %v311_v59  ;;  %v320_v62 = vsub.f32 1.0, %v319_v58  ;;  %vm355_vm11 = vmor %vm353_vm6, %vm354_vm8  ;;  %v344_v25 = vand.u32 2147483648, %v301_v55  ;;  %v342_v27 = vand.u32 2147483647, %v301_v55 }
 0x1cc   : > { %365 = vperm.xlu2 %562, %v316_v61   ;;  %v350_v63 = vsub.f32 1.0, %v349_v60  ;;  %vm338_vm15 = vweird.f32 %v301_v55 }
 0x1cd   : > { %v321_v5 = vmul.f32 %v576_v54, %v320_v62  ;;  %v345_v29 = vor.u32 1.1754944e-38, %v344_v25  ;;  %vm343_vm1 = vcmp.eq.f32.partialorder %v342_v27, 8.507059e+37 }
 0x1ce   : > { %v351_v11 = vmul.f32 %v578_v57, %v350_v63 }
 0x1cf   : > { %v322_v14 = vadd.f32 %v576_v54, %v321_v5 }
 0x1d0   : > { %v580_v15 = vpop.eup %579  ;;  %v352_v16 = vadd.f32 %v578_v57, %v351_v11 }
 0x1d1   : > { %v326_v18 = vsel %vm325_vm10, %v576_v54, %v322_v14  ;;  %v334_v20 = vmul.f32 %v580_v15, %v301_v55  ;;  %vm339_vm14 = vweird.f32 %v580_v15 }
 0x1d2   : > { %v356_v21 = vsel %vm355_vm11, %v578_v57, %v352_v16  ;;  %v331_v23 = vsel %vm328_vm13, %v330_v19, %v326_v18  ;;  %vm340_vm0 = vmor %vm338_vm15, %vm339_vm14 }
 0x1d3   : > { %v361_v22 = vsel %vm358_vm12, %v360_v17, %v356_v21  ;;  %v335_v24 = vsub.f32 1.0, %v334_v20 }
 0x1d4   : > { %380 = vperm.xlu1 %564, %v361_v22   ;;  %370 = vperm.xlu2 %562, %v331_v23  }
 0x1d5   : > { %v336_v26 = vmul.f32 %v580_v15, %v335_v24 }
 0x1d7   : > { %v337_v28 = vadd.f32 %v580_v15, %v336_v26 }
 0x1d9   : > { %v341_v30 = vsel %vm340_vm0, %v580_v15, %v337_v28 }
 0x1da   : > { %v346_v31 = vsel %vm343_vm1, %v345_v29, %v341_v30 }
 0x1db   : > { %375 = vperm.xlu0 %563, %v346_v31  }
 0x226   : > { %v366_v32 = vpop.permute.xlu2 %365 }
 0x227   : > { %v383_v33 = vmul.f32 %v366_v32, %v816_v8  ;;  %v384_v34 = vmul.f32 %v366_v32, %v818_v9 }
 0x229   : > { %391 = vst [vmem:[%s190_s22] sm:$0xff] %v383_v33 }
 0x22a   : > { %392 = vst [vmem:[%s190_s22 + $0x8] sm:$0xff] %v384_v34 }
 0x22e   : > { %v371_v35 = vpop.permute.xlu2 %370 }
 0x22f   : > { %v385_v36 = vmul.f32 %v371_v35, %v804_v2  ;;  %v386_v37 = vmul.f32 %v371_v35, %v808_v4 }
 0x231   : > { %393 = vst [vmem:[%s190_s22 + $0x10] sm:$0xff] %v385_v36 }
 0x232   : > { %394 = vst [vmem:[%s190_s22 + $0x18] sm:$0xff] %v386_v37 }
 0x246   : > { %v381_v38 = vpop.permute.xlu1 %380 }
 0x247   : > { %v389_v39 = vmul.f32 %v381_v38, %v800_v0  ;;  %v390_v8 = vmul.f32 %v381_v38, %v802_v1 }
 0x249   : > { %397 = vst [vmem:[%s190_s22 + $0x30] sm:$0xff] %v389_v39 }
 0x24a   : > { %398 = vst [vmem:[%s190_s22 + $0x38] sm:$0xff] %v390_v8 }
 0x24d   : > { %v376_v2 = vpop.permute.xlu0 %375 }
 0x24e   : > { %v387_v4 = vmul.f32 %v376_v2, %v812_v6  ;;  %v388_v9 = vmul.f32 %v376_v2, %v814_v7 }
 0x250   : > { %395 = vst [vmem:[%s190_s22 + $0x20] sm:$0xff] %v387_v4 }
 0x251   : > { %396 = vst [vmem:[%s190_s22 + $0x28] sm:$0xff] %v388_v9 }
 0x252   : > { %638 = shalt.err (!%p635_p4)
}
 0x253   : > { %s682_s29 = smov 256   ;;  %s683_s17 = smov 16  }
 0x254   : > { %513 = dma.vmem_to_hbm [thread:$0]  (%p754_p11), %s413_s4, 1024, %s415_s6, %s400_s16, %s682_s29, %s682_s29, %s683_s17  }
 0x255 PF: > { %s429_s19 = sand.u32 1, %s665_s12   ;;  %p891_p7 = scmp.ge.s32.totalorder %s677_s15, 2 }
 0x256   : > { %s430_s20 = scalar_lea.sflag [#allocation4], %s429_s19 }
 0x257   : > { %p520_p5 = pnand %p891_p7, %p758_p12 }
 0x259   : > { %p521_p8 = pneg %p520_p5 }
 0x25b   : > { %660 = dma.done.wait (%p521_p8), %s430_s20, 1024  }
 0x25c   : > { %662 = vsyncadd (%p521_p8), %s430_s20, 4294966272  ;;  %p16_p10 = scmp.ge.s32.totalorder %s729_s18, 4   ;;  %s892_s12 = smov %s669_s13 }
 0x25d   : > { %s893_s13 = smov %s673_s14  ;;  %s894_s14 = smov %s741_s21 }
 0x25e   : > { %s895_s15 = smov %s729_s18  ;;  %18 = sbr.rel (!%p16_p10) target bundleno = 5 (0x5), region = 77 }
 0x263   :  { %436 = vsyncpa [#allocation3], 1 }
 0x264   :  { %438 = vsyncpa [#allocation3 + $0x1], 1 }
 0x265   :  { %439 = vsyncpa [#allocation4], 1 }
 0x266   :  { %441 = vsyncpa [#allocation4 + $0x1], 1 }

</bundles_post_ra>
